<compile_context>
chip_gen: v5e
topology: v5e:2x2
jax: 0.10.0
libtpu: 0.0.40
codegen_flags: <defaults>
</compile_context>

<pallas_src>
import functools

import jax
import jax.numpy as jnp
from jax.experimental import pallas as pl
from jax.experimental.pallas import tpu as pltpu


_LANE = 128
_HALO = 128                       # halo width along T (multiple of 128, >= K-1)
_VMEM_BUDGET = 28 * 1024 * 1024   # per-step working-set target (fits every gen)


def _round_up(v, m):
    return (v + m - 1) // m * m


def _conv1d_kernel(x_ref, *rest, k_size, out_blk, im2col, has_halo):
    """One (time-tile, batch) grid step.

    x_ref : (1, C_in, x_blk)        main input tile (compute dtype)
    h_ref : (1, C_in, _HALO)        first 128 cols of the next tile (if has_halo)
    w_ref : (C_out, K*C_in)  [im2col]   or   (K, C_out, C_in)  [K-dots]
    b_ref : (C_out, 1)              f32 bias
    o_ref : (1, C_out, out_blk)     output tile
    xbuf  : (C_in, x_blk [+ _HALO]) persistent VMEM scratch (compute dtype)
    """
    if has_halo:
        h_ref, w_ref, b_ref, o_ref, xbuf = rest
    else:
        w_ref, b_ref, o_ref, xbuf = rest

    x_blk = x_ref.shape[-1]
    # Aligned stores into the persistent scratch (replaces the old concatenate).
    xbuf[:, :x_blk] = x_ref[0]
    if has_halo:
        xbuf[:, x_blk:] = h_ref[0]

    if im2col:
        # Fold K into the contraction: one MXU dot of depth K*C_in.
        if k_size == 1:
            rhs = xbuf[:, :out_blk]
        else:
            rhs = jnp.concatenate(
                [xbuf[:, k:k + out_blk] for k in range(k_size)], axis=0)
        acc = jnp.dot(w_ref[...], rhs, preferred_element_type=jnp.float32)
        acc = acc + b_ref[...]                      # (C_out,1) broadcast over lanes
    else:
        # Wide-C_in fallback: K shifted dots with f32 accumulation.
        # TODO(synk): sub-chunk the time axis here so the accumulator stays in
        # vregs when C_out * out_blk * 4B exceeds the vreg file.
        c_out = o_ref.shape[1]
        acc = jnp.broadcast_to(b_ref[...], (c_out, out_blk))
        for k in range(k_size):                     # K small & static -> unrolled
            acc = acc + jnp.dot(w_ref[k], xbuf[:, k:k + out_blk],
                                preferred_element_type=jnp.float32)

    o_ref[0] = acc.astype(o_ref.dtype)


def norm_conv1d(x, weight, bias, *, t_tile=None, compute_dtype=jnp.bfloat16,
                use_im2col=None):
    """NormConv1d forward: valid 1-D conv.  x:(B,C_in,T) w:(C_out,C_in,K) b:(C_out,)."""
    B, C_in, T = x.shape
    C_out, C_in_w, K = weight.shape
    assert C_in == C_in_w
    T_out = T - K + 1
    assert T_out >= 1

    out_dtype = x.dtype
    if compute_dtype is None:
        compute_dtype = x.dtype
    if use_im2col is None:
        # single dot of depth K*C_in wins while the MXU contraction is under-filled
        use_im2col = C_in < 256

    cbytes = jnp.dtype(compute_dtype).itemsize
    obytes = jnp.dtype(out_dtype).itemsize

    def step_bytes(tt):                       # per-grid-step VMEM working set
        xio = 2 * C_in * (tt + _HALO) * cbytes            # double-buffered x (+halo)
        oio = 2 * C_out * tt * obytes                     # double-buffered out
        wb = 2 * C_out * C_in * K * cbytes + 2 * C_out * 4
        scratch = C_in * (tt + _HALO) * cbytes            # xbuf
        rhs = K * C_in * tt * cbytes if use_im2col else 0
        acc = C_out * tt * 4
        return xio + oio + wb + scratch + rhs + acc

    # Large time tiles amortize per-step overhead and the fixed halo re-read;
    # cap is shrunk until the working set fits the cross-generation VMEM budget.
    cap = 2048
    while cap > 256 and step_bytes(cap) > _VMEM_BUDGET:
        cap //= 2

    single_tile = (t_tile is None and T_out <= cap) or \
                  (t_tile is not None and t_tile >= T_out)
    if single_tile:
        # Full-extent blocks along time: no halo, no padding, masked edge stores.
        out_blk, x_blk, has_halo = T_out, T, False
        n_t = 1
    else:
        assert K - 1 <= _HALO, "kernel_size - 1 must fit in the 128-wide halo"
        if t_tile is None:
            t0 = min(cap, (T_out // _LANE) * _LANE)
            n_guess = pl.cdiv(T_out, t0)
            # Balance tiles so the last one isn't mostly padding.
            t_tile = _round_up(pl.cdiv(T_out, n_guess), _LANE)
        assert t_tile % _LANE == 0, "t_tile must be a multiple of 128"
        assert _LANE <= t_tile <= T_out
        out_blk, x_blk, has_halo = t_tile, t_tile, True
        n_t = pl.cdiv(T_out, t_tile)

    # Raise the scoped-VMEM limit only when the working set actually needs it.
    est = step_bytes(out_blk)
    vmem_limit = None
    if est > 12 * 1024 * 1024:
        vmem_limit = int(min(max(int(est * 1.5), 32 * 1024 * 1024),
                             48 * 1024 * 1024))

    # bf16 operands by default; accumulation stays f32 in the kernel.
    x_c = x if x.dtype == compute_dtype else x.astype(compute_dtype)
    if use_im2col:
        # (C_out, K*C_in): rows of the im2col RHS are k-major, c_in-minor.
        w_k = jnp.transpose(weight, (0, 2, 1)).reshape(C_out, K * C_in)
        w_spec = pl.BlockSpec((C_out, K * C_in), lambda j, b: (0, 0))
    else:
        # (K, C_out, C_in): C_in lane-dense, indexed per k inside the kernel.
        w_k = jnp.transpose(weight, (2, 0, 1))
        w_spec = pl.BlockSpec((K, C_out, C_in), lambda j, b: (0, 0, 0))
    w_k = w_k.astype(compute_dtype)
    bias2d = bias.astype(jnp.float32).reshape(C_out, 1)
    # TODO(synk): weight/bias keep the default double buffer despite constant
    # index maps; pl.Buffered(1) pipeline_mode would save one resident copy.

    in_specs = [pl.BlockSpec((1, C_in, x_blk), lambda j, b: (b, 0, j))]
    operands = [x_c]
    if has_halo:
        halo_ratio = t_tile // _HALO
        max_halo_blk = pl.cdiv(T, _HALO) - 1   # clamp: halo DMA never starts OOB;
        in_specs.append(pl.BlockSpec(          # clamped data only feeds discarded cols
            (1, C_in, _HALO),
            lambda j, b: (b, 0, jnp.minimum((j + 1) * halo_ratio, max_halo_blk))))
        operands.append(x_c)
    in_specs += [w_spec, pl.BlockSpec((C_out, 1), lambda j, b: (0, 0))]
    operands += [w_k, bias2d]

    kernel = functools.partial(_conv1d_kernel, k_size=K, out_blk=out_blk,
                               im2col=use_im2col, has_halo=has_halo)

    return pl.pallas_call(
        kernel,
        out_shape=jax.ShapeDtypeStruct((B, C_out, T_out), out_dtype),
        grid_spec=pltpu.PrefetchScalarGridSpec(
            num_scalar_prefetch=0,
            grid=(n_t, B),                 # long time axis leads (megacore balance)
            in_specs=in_specs,
            out_specs=pl.BlockSpec((1, C_out, out_blk), lambda j, b: (b, 0, j)),
            scratch_shapes=[
                pltpu.VMEM((C_in, x_blk + (_HALO if has_halo else 0)),
                           compute_dtype)],
        ),
        compiler_params=pltpu.CompilerParams(
            dimension_semantics=("parallel", "parallel"),
            vmem_limit_bytes=vmem_limit,
        ),
    )(*operands)


def _conv1d_ref(x, weight, bias):
    """Pure-JAX reference (valid conv, stride 1)."""
    out = jax.lax.conv_general_dilated(
        x, weight, window_strides=(1,), padding="VALID",
        dimension_numbers=("NCH", "OIH", "NCH"))
    return out + bias.reshape(1, -1, 1)


def _make_inputs(key, B, C_in, C_out, T, K):
    kx, kw, kb = jax.random.split(key, 3)
    x = jax.random.normal(kx, (B, C_in, T), dtype=jnp.float32)
    # nn.Conv1d-style uniform(-bound, bound), bound = 1/sqrt(C_in*K)
    bound = 1.0 / jnp.sqrt(jnp.float32(C_in * K))
    weight = jax.random.uniform(kw, (C_out, C_in, K), jnp.float32, -bound, bound)
    bias = jax.random.uniform(kb, (C_out,), jnp.float32, -bound, bound)
    return x, weight, bias


if __name__ == "__main__":
    key = jax.random.PRNGKey(0)
    k1, k2 = jax.random.split(key)

    # Test 1: NormConv1d(4, 8, kernel_size=3)-like shapes, single tile.
    B, C_in, C_out, T, K = 2, 4, 8, 16, 3
    x, w, b = _make_inputs(k1, B, C_in, C_out, T, K)
    ref = _conv1d_ref(x, w, b)

    out_bf16 = jax.block_until_ready(norm_conv1d(x, w, b))       # default bf16 compute
    assert out_bf16.shape == (B, C_out, T - K + 1)
    assert jnp.allclose(out_bf16, ref, atol=5e-2, rtol=5e-2), "bf16 mismatch"

    out_f32 = jax.block_until_ready(norm_conv1d(x, w, b, compute_dtype=jnp.float32))
    assert jnp.allclose(out_f32, ref, atol=1e-5, rtol=1e-5), "f32 mismatch (single tile)"

    # Test 2: multiple time tiles + ragged last tile (exercises halo + edge masking).
    B2, C_in2, C_out2, T2, K2 = 2, 4, 8, 300, 3
    x2, w2, b2 = _make_inputs(k2, B2, C_in2, C_out2, T2, K2)
    ref2 = _conv1d_ref(x2, w2, b2)
    out2 = jax.block_until_ready(
        norm_conv1d(x2, w2, b2, t_tile=128, compute_dtype=jnp.float32))
    assert out2.shape == (B2, C_out2, T2 - K2 + 1)
    assert jnp.allclose(out2, ref2, atol=1e-5, rtol=1e-5), "f32 mismatch (multi tile)"

    # Test 3: wide-C_in fallback path (K shifted dots) forced.
    out3 = jax.block_until_ready(
        norm_conv1d(x2, w2, b2, t_tile=128, compute_dtype=jnp.float32,
                    use_im2col=False))
    assert jnp.allclose(out3, ref2, atol=1e-5, rtol=1e-5), "f32 mismatch (K-dots path)"

    print("KERNEL_OK")
</pallas_src>

<mosaic_0001>
module attributes {stable_mosaic.version = 11 : i64} {
  func.func @_conv1d_kernel(%arg0: i32, %arg1: i32, %arg2: memref<1x4x16xbf16, #tpu.memory_space<vmem>>, %arg3: memref<8x12xbf16, #tpu.memory_space<vmem>>, %arg4: memref<8x1xf32, #tpu.memory_space<vmem>>, %arg5: memref<1x8x14xf32, #tpu.memory_space<vmem>>, %arg6: memref<4x16xbf16, #tpu.memory_space<vmem>>) attributes {dimension_semantics = [#tpu.dimension_semantics<parallel>, #tpu.dimension_semantics<parallel>], iteration_bounds = array<i64: 1, 2>, scalar_prefetch = 0 : i64, scratch_operands = 1 : i64, tpu.core_type = #tpu.core_type<tc>, window_params = [{transform_indices = @transform_0, window_bounds = array<i64: 1, 4, 16>}, {pipeline_mode = #tpu.pipeline_mode<synchronous>, transform_indices = @transform_1, window_bounds = array<i64: 8, 12>}, {pipeline_mode = #tpu.pipeline_mode<synchronous>, transform_indices = @transform_2, window_bounds = array<i64: 8, 1>}, {transform_indices = @transform_3, window_bounds = array<i64: 1, 8, 14>}]} {
    %c0 = arith.constant 0 : index
    %c0_0 = arith.constant 0 : index
    %c0_1 = arith.constant 0 : index
    %0 = vector.load %arg2[%c0, %c0_0, %c0_1] : memref<1x4x16xbf16, #tpu.memory_space<vmem>>, vector<1x4x16xbf16>
    %1 = vector.shape_cast %0 : vector<1x4x16xbf16> to vector<4x16xbf16>
    %c0_2 = arith.constant 0 : index
    %c0_3 = arith.constant 0 : index
    %2 = vector.load %arg6[%c0_2, %c0_3] : memref<4x16xbf16, #tpu.memory_space<vmem>>, vector<4x16xbf16>
    tpu.vector_store %arg6[%c0_2, %c0_3], %1 {strides = array<i32>} : memref<4x16xbf16, #tpu.memory_space<vmem>>, vector<4x16xbf16>,
    %c0_4 = arith.constant 0 : index
    %c0_5 = arith.constant 0 : index
    %3 = vector.load %arg6[%c0_4, %c0_5] : memref<4x16xbf16, #tpu.memory_space<vmem>>, vector<4x14xbf16>
    %c0_6 = arith.constant 0 : index
    %c1 = arith.constant 1 : index
    %4 = vector.load %arg6[%c0_6, %c1] : memref<4x16xbf16, #tpu.memory_space<vmem>>, vector<4x14xbf16>
    %c0_7 = arith.constant 0 : index
    %c2 = arith.constant 2 : index
    %5 = vector.load %arg6[%c0_7, %c2] : memref<4x16xbf16, #tpu.memory_space<vmem>>, vector<4x14xbf16>
    %6 = tpu.concatenate %3, %4, %5 in 0 : vector<4x14xbf16>, vector<4x14xbf16>, vector<4x14xbf16> -> vector<12x14xbf16>
    %c0_8 = arith.constant 0 : index
    %c0_9 = arith.constant 0 : index
    %7 = vector.load %arg3[%c0_8, %c0_9] : memref<8x12xbf16, #tpu.memory_space<vmem>>, vector<8x12xbf16>
    %cst = arith.constant dense<0.000000e+00> : vector<8x14xf32>
    %8 = tpu.matmul %7, %6, %cst {dimension_numbers = #tpu.dot_dimension_numbers<[1], [0], [0], [1], [0, 0, 1, 1], [], []>} : vector<8x12xbf16>, vector<12x14xbf16>, vector<8x14xf32> -> vector<8x14xf32>
    %c0_10 = arith.constant 0 : index
    %c0_11 = arith.constant 0 : index
    %9 = vector.load %arg4[%c0_10, %c0_11] : memref<8x1xf32, #tpu.memory_space<vmem>>, vector<8x1xf32>
    %10 = vector.broadcast %9 : vector<8x1xf32> to vector<8x14xf32>
    %11 = arith.addf %8, %10 : vector<8x14xf32>
    %c0_12 = arith.constant 0 : index
    %c0_13 = arith.constant 0 : index
    %c0_14 = arith.constant 0 : index
    %12 = vector.load %arg5[%c0_12, %c0_13, %c0_14] : memref<1x8x14xf32, #tpu.memory_space<vmem>>, vector<1x8x14xf32>
    %13 = vector.shape_cast %12 : vector<1x8x14xf32> to vector<8x14xf32>
    %14 = vector.shape_cast %11 : vector<8x14xf32> to vector<1x8x14xf32>
    tpu.vector_store %arg5[%c0_12, %c0_13, %c0_14], %14 {strides = array<i32>} : memref<1x8x14xf32, #tpu.memory_space<vmem>>, vector<1x8x14xf32>,
    return
  }
  func.func @transform_0(%arg0: i32, %arg1: i32) -> (i32, i32, i32) {
    %c0_i32 = arith.constant 0 : i32
    %c0_i32_0 = arith.constant 0 : i32
    return %arg1, %c0_i32, %arg0 : i32, i32, i32
  }
  func.func @transform_1(%arg0: i32, %arg1: i32) -> (i32, i32) {
    %c0_i32 = arith.constant 0 : i32
    %c0_i32_0 = arith.constant 0 : i32
    %c0_i32_1 = arith.constant 0 : i32
    return %c0_i32, %c0_i32_0 : i32, i32
  }
  func.func @transform_2(%arg0: i32, %arg1: i32) -> (i32, i32) {
    %c0_i32 = arith.constant 0 : i32
    %c0_i32_0 = arith.constant 0 : i32
    %c0_i32_1 = arith.constant 0 : i32
    return %c0_i32, %c0_i32_0 : i32, i32
  }
  func.func @transform_3(%arg0: i32, %arg1: i32) -> (i32, i32, i32) {
    %c0_i32 = arith.constant 0 : i32
    %c0_i32_0 = arith.constant 0 : i32
    return %arg1, %c0_i32, %arg0 : i32, i32, i32
  }
}

</mosaic_0001>

<bundles_post_ra>
// kernel: tpu_custom_call.1
= control target key start
LH: loop header
LB: loop body
LE: loop exit
PB: predicated region body
PF: predicated region fallthrough
CT: control target
= control target key end

     0   :  { %8 = vsyncpa [#allocation4], 0  ;;  %s610_s0 = inlined_call_operand.vmem [shape: bf16[2,4,16], index: 0, kind: input, shape index: {}]   ;;  %s611_s1 = inlined_call_operand.vmem [shape: bf16[8,12], index: 1, kind: input, shape index: {}]   ;;  %s612_s2 = inlined_call_operand.vmem [shape: f32[8,1], index: 2, kind: input, shape index: {}]   ;;  %s613_s3 = inlined_call_operand.hbm [shape: f32[2,8,14], index: 3, kind: output, shape index: {}]  }
   0x1   :  { %10 = vsyncpa [#allocation4 + $0x1], 0  ;;  %s507_s12 = smov 0   ;;  %s509_s13 = smov 0  }
   0x2   :  { %s511_s14 = smov 0   ;;  %s513_s15 = smov 0  }
   0x3   :  { %s515_s16 = smov 0   ;;  %s517_s17 = smov 0  }
   0x4 LB: > { %s332_s18 = sadd.s32 4294967295, %s482_s17   ;;  %s333_s19 = sadd.s32 4294967294, %s482_s17   ;;  %s482_s17 = sphi %s517_s17, %s16_s17   ;;  %s478_s16 = sphi %s515_s16, %s620_s16   ;;  %s474_s15 = sphi %s513_s15, %s619_s15   ;;  %s470_s14 = sphi %s511_s14, %s618_s14   ;;  %s466_s13 = sphi %s509_s13, %s617_s13   ;;  %s462_s12 = sphi %s507_s12, %s616_s12  }
   0x5   : > { %s25_s20 = sadd.s32 1, %s478_s16  ;;  %s107_s21 = sadd.s32 1, %s470_s14 }
   0x6   : > { %p26_p0 = scmp.ge.s32.totalorder %s25_s20, 2  ;;  %p117_p1 = scmp.ne.s32.totalorder %s470_s14, %s466_s13 }
   0x7   : > { %p118_p2 = scmp.eq.s32.totalorder %s332_s18, 1  ;;  %p123_p3 = scmp.ne.s32.totalorder %s466_s13, %s462_s12 }
   0x8   : > { %s622_s20 = smov (%p26_p0, %s25_s20), 0  ;;  %p124_p5 = scmp.eq.s32.totalorder %s333_s19, 1 }
   0x9   : > { %p547_p4 = por %p118_p2, %p117_p1  ;;  %s102_s23 = ssub.s32 %s478_s16, %s622_s20 }
   0xa   : > { %p336_p6 = scmp.ge.s32.totalorder %s482_s17, 1  ;;  %p105_p7 = scmp.eq.s32.totalorder %s102_s23, 0 }
   0xb   : > { %p554_p8 = por %p124_p5, %p123_p3  ;;  %p158_p9 = scmp.lt.s32.totalorder %s482_s17, 3 }
   0xc   : > { %s560_s25 = scalar_select %p105_p7, %s470_s14, %s107_s21  }
   0xd   : > { %p159_p10 = pnand %p336_p6, %p158_p9 }
   0xe   : > { %p184_p11 = scmp.lt.s32.totalorder (!%p159_p10), %s474_s15, 1  ;;  %s484_s4 = smov (!%p159_p10), 127  }
   0xf   : > { %162 = sbr.rel (%p159_p10) target bundleno = 303 (0x12f), region = 32  ;;  %s485_s5 = smov (!%p159_p10), 126  }
  0x10   : > { %s181_s10 = sand.u32 (!%p159_p10), 1, %s466_s13   ;;  %s341_s11 = sshll.u32 (!%p159_p10), %s474_s15, 3 }
  0x11   : > { %s337_s18 = sshll.u32 (!%p159_p10), %s181_s10, 3  ;;  %s256_s23 = scalar_lea.hbm (!%p159_p10), %s613_s3, %s341_s11 }
  0x12   : > { %s260_s28 = sshll.u32 (!%p159_p10), %s256_s23, 4  ;;  %s245_s29 = scalar_lea.sflag (!%p159_p10), [#allocation4], %s181_s10  ;;  %s261_s28 = int_to_ptr.hbm [resolvable:$true] %s260_s28 }
  0x13   : > { %s424_s6 = scalar_lea.hbm (!%p159_p10), %s613_s3, 16 }
  0x14   : > { %s185_s26 = scalar_select %p184_p11, %s474_s15, 1  ;;  %vm193_vm0 = vcmask 123904   ;;  %v216_v4 = vld [vmem:[%s612_s2] sm:$0xff]  ;;  %v486_v5 = vmov 0   ;;  %vm209_vm1 = vcmask 1041408   ;;  %vm212_vm2 = vcmask 1043456  }
  0x15   : > { %402 = vset.pattern.permute.xlu1 %v486_v5  ;;  %403 = vset.pattern.permute.xlu0 %v486_v5  ;;  %vm226_vm3 = vcmask 1045504   ;;  %v215_v11 = vld [vmem:[%s611_s1] sm:$0xf]  ;;  %vm222_vm4 = vcmask 97280   ;;  %vm242_vm5 = vcmask 113664  }
  0x16   : > { %s338_s27 = sshll.u32 %s185_s26, 1  ;;  %219 = vperm.xlu1 %402, %v216_v4   ;;  %s183_s26 = scalar_lea.vmem [#allocation3], %s337_s18 }
  0x17   : > { %s190_s30 = scalar_lea.vmem %s610_s0, %s338_s27  ;;  %s258_s27 = sshll.u32 %s183_s26, 4  ;;  %s259_s27 = int_to_ptr.vmem [resolvable:$true] %s258_s27 }
  0x18   : > { %v192_v0 = vld [vmem:[%s190_s30] sm:$0x3]  ;;  %s418_s30 = sshra.s32 %s261_s28, 4  ;;  %s419_s30 = int_to_ptr.hbm [resolvable:$true] %s418_s30 }
  0x19   : > { %194 = vst.msk [vmem:[#allocation2] sm:$0x3] %vm193_vm0, %v192_v0  ;;  %s420_s15 = scalar_lea.hbm %s419_s30, 8  ;;  %p425_p1 = scmp.lt.s32.totalorder %s419_s30, %s613_s3 }
  0x1a   : > { %p421_p12 = scmp.ne.s32.totalorder %s419_s30, %s420_s15  ;;  %p426_p2 = scmp.lt.s32.totalorder %s424_s6, %s420_s15 }
  0x1c   : > { %p422_p13 = pnand %p421_p12, %p547_p4  ;;  %p427_p3 = por %p426_p2, %p425_p1 }
  0x1e   : > { %p423_p0 = pneg %p422_p13 }
  0x20   : > { %v195_v1 = vld [vmem:[#allocation2] sm:$0x3]  ;;  %p428_p5 = pnand %p427_p3, %p423_p0 }
  0x21   : > { %198 = vst [vmem:[#allocation1 + $0x1] ss:$4 sm:$0xff] %v195_v1 }
  0x28   : > { %v199_v2 = vld.sshfl [vmem:[#allocation1] sm:$0xff pattern:$0x73625140] }
  0x29   : > { %201 = vrot.lane.b32.xlu0 %v199_v2, %s484_s4  ;;  %204 = vst [vmem:[#allocation1 + $0x2] ss:$4 sm:$0xff] %v195_v1 }
  0x30   : > { %v205_v3 = vld.sshfl [vmem:[#allocation1] sm:$0xff pattern:$0x73625140] }
  0x31   : > { %207 = vrot.lane.b32.xlu0 %v205_v3, %s485_s5 }
  0x88   : > { %v220_v12 = vpop.permute.xlu1 %219 }
  0x9b   : > { %v202_v6 = vpop.permute.xlu0 %201 }
  0x9c   : > { %v211_v7 = vsel %vm209_vm1, %v195_v1, %v202_v6 }
  0xa3   : > { %v208_v8 = vpop.permute.xlu0 %207 }
  0xa4   : > { %v214_v9 = vsel %vm212_vm2, %v211_v7, %v208_v8 }
  0xa5   : > { %v227_v10 = vsel %vm226_vm3, %v214_v9, 0 }
  0xa6   : > { %236 = vmatpush.bf16.msra.mxu0 %v227_v10 }
  0xa9   : > { %339 = vmatmul.msk.bf16.vlgmr.msra.gmra.mxu0 %vm222_vm4, %v215_v11 }
 0x126   : > { %v238_v13 = vpop.f32.mrf.mxu0 }
 0x127   : > { %v239_v14 = vadd.f32 %v238_v13, %v220_v12 }
 0x129   : > { %243 = vst.msk [vmem:[%s183_s26] sm:$0xff] %vm242_vm5, %v239_v14 }
 0x12a   : > { %431 = shalt.err (!%p428_p5)
}
 0x12b   : > { %344 = dma.vmem_to_hbm [thread:$0]  (%p547_p4), %s259_s27, 128, %s261_s28, %s245_s29  }
 0x12e   : > { %v240_v15 = vpop.f32.mrf.mxu0 }
 0x12f PF: > { %p350_p6 = scmp.ge.s32.totalorder %s482_s17, 2  ;;  %s272_s9 = sand.u32 1, %s462_s12  }
 0x130   : > { %s273_s10 = scalar_lea.sflag [#allocation4], %s272_s9 }
 0x131   : > { %p347_p7 = pnand %p350_p6, %p554_p8 }
 0x133   : > { %p348_p9 = pneg %p347_p7 }
 0x135   : > { %457 = dma.done.wait (%p348_p9), %s273_s10, 128  }
 0x136   : > { %459 = vsyncadd (%p348_p9), %s273_s10, 4294967168  ;;  %s16_s17 = sadd.s32 1, %s482_s17   ;;  %s616_s12 = smov %s466_s13 }
 0x137   : > { %p13_p10 = scmp.ge.s32.totalorder %s16_s17, 4   ;;  %s617_s13 = smov %s470_s14 }
 0x138   : > { %s618_s14 = smov %s560_s25  ;;  %s619_s15 = smov %s478_s16 }
 0x139   : > { %s620_s16 = smov %s622_s20  ;;  %15 = sbr.rel (!%p13_p10) target bundleno = 4 (0x4), region = 69 }
 0x13e   :  { %279 = vsyncpa [#allocation4], 1 }
 0x13f   :  { %281 = vsyncpa [#allocation4 + $0x1], 1 }

</bundles_post_ra>
